<compile_context>
chip_gen: v5e
topology: v5e:2x2
jax: 0.10.0
libtpu: 0.0.40
codegen_flags: <defaults>
</compile_context>

<pallas_src>
import functools

import jax
import jax.numpy as jnp
from jax.experimental import pallas as pl
from jax.experimental.pallas import tpu as pltpu


def _round_up(x, m):
    return ((x + m - 1) // m) * m


def _choose_tile(B, max_tb):
    """Largest multiple-of-8 tile <= max_tb that minimizes padding waste."""
    best_tb = 8
    best_pad = _round_up(B, 8)
    upper = min(max_tb, _round_up(B, 8))
    for tb in range(8, upper + 1, 8):
        pad = _round_up(B, tb)
        if pad < best_pad or (pad == best_pad and tb > best_tb):
            best_pad, best_tb = pad, tb
    return best_tb, best_pad


def _mf_kernel(ids_ref, user_tab_ref, item_tab_ref, out_ref):
    # ids_ref      : SMEM [2 * B_pad] int32  (uid0, iid0, uid1, iid1, ...)
    # user_tab_ref : VMEM [U, D] float32     (full table, resident, 1 buffer)
    # item_tab_ref : VMEM [I, D] float32     (full table, resident, 1 buffer)
    # out_ref      : VMEM [TB, 2*D] float32  (lane-dense output slab)
    TB = out_ref.shape[0]
    D = user_tab_ref.shape[1]
    base = pl.program_id(0) * TB

    @pl.loop(0, TB)
    def _(r):
        row = base + r
        uid = ids_ref[2 * row]          # scalar reads from SMEM
        iid = ids_ref[2 * row + 1]
        # Direct row gather: dynamic-sublane loads from the resident tables,
        # two direct half-row stores (no concatenate / lane shuffle).
        out_ref[pl.ds(r, 1), 0:D] = user_tab_ref[pl.ds(uid, 1), :]
        out_ref[pl.ds(r, 1), D:2 * D] = item_tab_ref[pl.ds(iid, 1), :]


@functools.partial(jax.jit, static_argnames=("max_tb",))
def mf_forward(x, user_table, item_table, *, max_tb=512):
    """Pallas equivalent of MF.forward.

    x           : [B, 2] integer array of (uid, iid)
    user_table  : [uid_all, D] float32
    item_table  : [iid_all + 1, D] float32
    returns     : [B, 2, D] float32
    """
    B = x.shape[0]
    U, D = user_table.shape
    I, _ = item_table.shape

    x = x.astype(jnp.int32)

    TB, B_pad = _choose_tile(B, max_tb)
    if B_pad != B:
        x = jnp.pad(x, ((0, B_pad - B), (0, 0)))   # pad ids = 0 (valid row)
    num_blocks = B_pad // TB

    # Flattened 1-D ids for SMEM scalar prefetch (avoids 2-D SMEM 128-word
    # last-dim padding blow-up).
    ids = x.reshape(-1)                            # [2 * B_pad] int32

    # Explicit scoped-VMEM budget: resident tables (single buffer each) +
    # double-buffered output tile + headroom.  v5e default is only 16 MiB.
    table_bytes = (U * D + I * D) * 4
    out_tile_bytes = TB * 2 * D * 4
    vmem_limit = int(min(64 * 2**20,
                         max(table_bytes + 2 * out_tile_bytes + (2 << 20),
                             16 * 2**20)))

    grid_spec = pltpu.PrefetchScalarGridSpec(
        num_scalar_prefetch=1,                      # ids -> SMEM
        grid=(num_blocks,),
        in_specs=[
            # Whole tables resident in VMEM, single copy (no pipeline
            # double-buffering of grid-invariant blocks).
            pl.BlockSpec(memory_space=pltpu.MemorySpace.VMEM),
            pl.BlockSpec(memory_space=pltpu.MemorySpace.VMEM),
        ],
        out_specs=pl.BlockSpec((TB, 2 * D), lambda i, ids: (i, 0)),
    )

    out_flat = pl.pallas_call(
        _mf_kernel,
        out_shape=jax.ShapeDtypeStruct((B_pad, 2 * D), user_table.dtype),
        grid_spec=grid_spec,
        compiler_params=pltpu.CompilerParams(
            dimension_semantics=("parallel",),
            vmem_limit_bytes=vmem_limit,
        ),
        cost_estimate=pl.CostEstimate(
            flops=0,
            transcendentals=0,
            bytes_accessed=table_bytes + 2 * B_pad * 4 + B_pad * 2 * D * 4,
        ),
    )(ids, user_table, item_table)

    # [B_pad, 2*D] -> [B, 2, D]  (layout plumbing outside the kernel)
    return out_flat[:B].reshape(B, 2, D)


if __name__ == "__main__":
    # Small, deterministic setup consistent with MF(uid_all, iid_all, latent_dim)
    uid_all = 16
    iid_all = 10          # item table has iid_all + 1 rows
    latent_dim = 32
    B = 8

    key = jax.random.PRNGKey(0)
    k_u, k_i, k_uid, k_iid = jax.random.split(key, 4)

    # torch.nn.Embedding default init ~ N(0, 1)
    user_table = jax.random.normal(k_u, (uid_all, latent_dim), dtype=jnp.float32)
    item_table = jax.random.normal(k_i, (iid_all + 1, latent_dim),
                                   dtype=jnp.float32)

    uids = jax.random.randint(k_uid, (B,), 0, uid_all, dtype=jnp.int32)
    iids = jax.random.randint(k_iid, (B,), 0, iid_all + 1, dtype=jnp.int32)
    x = jnp.stack([uids, iids], axis=1)  # [B, 2] int32

    out = mf_forward(x, user_table, item_table)
    out = jax.block_until_ready(out)

    # Reference check (plain JAX gather + concat, same semantics as torch code)
    ref = jnp.concatenate(
        [user_table[x[:, 0]][:, None, :], item_table[x[:, 1]][:, None, :]],
        axis=1,
    )
    assert out.shape == (B, 2, latent_dim)
    assert jnp.allclose(out, ref), "mismatch vs reference"

    print("KERNEL_OK")
</pallas_src>

<mosaic_0001>
module attributes {stable_mosaic.version = 11 : i64} {
  func.func @_mf_kernel(%arg0: i32, %arg1: memref<16xi32, #tpu.memory_space<smem>>, %arg2: memref<16x32xf32, #tpu.memory_space<vmem>>, %arg3: memref<11x32xf32, #tpu.memory_space<vmem>>, %arg4: memref<8x64xf32, #tpu.memory_space<vmem>>) attributes {dimension_semantics = [#tpu.dimension_semantics<parallel>], iteration_bounds = array<i64: 1>, scalar_prefetch = 1 : i64, scratch_operands = 0 : i64, tpu.core_type = #tpu.core_type<tc>, window_params = [{pipeline_mode = #tpu.pipeline_mode<synchronous>, transform_indices = @transform_0, window_bounds = array<i64: 16, 32>}, {pipeline_mode = #tpu.pipeline_mode<synchronous>, transform_indices = @transform_1, window_bounds = array<i64: 11, 32>}, {transform_indices = @transform_2, window_bounds = array<i64: 8, 64>}]} {
    %c8_i32 = arith.constant 8 : i32
    %0 = arith.muli %arg0, %c8_i32 : i32
    %c0_i32 = arith.constant 0 : i32
    %c8_i32_0 = arith.constant 8 : i32
    %1 = arith.addi %c0_i32, %c8_i32_0 : i32
    %c1_i32 = arith.constant 1 : i32
    scf.for %arg5 = %c0_i32 to %1 step %c1_i32  : i32 {
      %c1_i32_2 = arith.constant 1 : i32
      %2 = arith.muli %arg5, %c1_i32_2 : i32
      %c0_i32_3 = arith.constant 0 : i32
      %3 = arith.addi %c0_i32_3, %2 : i32
      %4 = arith.addi %0, %3 : i32
      %c2_i32 = arith.constant 2 : i32
      %5 = arith.muli %c2_i32, %4 : i32
      %6 = arith.index_cast %5 : i32 to index
      %7 = memref.load %arg1[%6] : memref<16xi32, #tpu.memory_space<smem>>
      %c2_i32_4 = arith.constant 2 : i32
      %8 = arith.muli %c2_i32_4, %4 : i32
      %c1_i32_5 = arith.constant 1 : i32
      %9 = arith.addi %8, %c1_i32_5 : i32
      %10 = arith.index_cast %9 : i32 to index
      %11 = memref.load %arg1[%10] : memref<16xi32, #tpu.memory_space<smem>>
      %12 = arith.index_cast %7 : i32 to index
      %c0 = arith.constant 0 : index
      %13 = vector.load %arg2[%12, %c0] : memref<16x32xf32, #tpu.memory_space<vmem>>, vector<1x32xf32>
      %14 = arith.index_cast %3 : i32 to index
      %c0_6 = arith.constant 0 : index
      %15 = vector.load %arg4[%14, %c0_6] : memref<8x64xf32, #tpu.memory_space<vmem>>, vector<1x32xf32>
      tpu.vector_store %arg4[%14, %c0_6], %13 {strides = array<i32>} : memref<8x64xf32, #tpu.memory_space<vmem>>, vector<1x32xf32>,
      %16 = arith.index_cast %11 : i32 to index
      %c0_7 = arith.constant 0 : index
      %17 = vector.load %arg3[%16, %c0_7] : memref<11x32xf32, #tpu.memory_space<vmem>>, vector<1x32xf32>
      %18 = arith.index_cast %3 : i32 to index
      %c32 = arith.constant 32 : index
      %19 = vector.load %arg4[%18, %c32] : memref<8x64xf32, #tpu.memory_space<vmem>>, vector<1x32xf32>
      tpu.vector_store %arg4[%18, %c32], %17 {strides = array<i32>} : memref<8x64xf32, #tpu.memory_space<vmem>>, vector<1x32xf32>,
    }
    %c8_i32_1 = arith.constant 8 : i32
    return
  }
  func.func @transform_0(%arg0: i32, %arg1: memref<16xi32, #tpu.memory_space<smem>>) -> (i32, i32) {
    %c0_i32 = arith.constant 0 : i32
    %c0_i32_0 = arith.constant 0 : i32
    %c0_i32_1 = arith.constant 0 : i32
    return %c0_i32, %c0_i32_0 : i32, i32
  }
  func.func @transform_1(%arg0: i32, %arg1: memref<16xi32, #tpu.memory_space<smem>>) -> (i32, i32) {
    %c0_i32 = arith.constant 0 : i32
    %c0_i32_0 = arith.constant 0 : i32
    %c0_i32_1 = arith.constant 0 : i32
    return %c0_i32, %c0_i32_0 : i32, i32
  }
  func.func @transform_2(%arg0: i32, %arg1: memref<16xi32, #tpu.memory_space<smem>>) -> (i32, i32) {
    %c0_i32 = arith.constant 0 : i32
    %c0_i32_0 = arith.constant 0 : i32
    return %arg0, %c0_i32 : i32, i32
  }
}

</mosaic_0001>

<bundles_post_ra>
// kernel: mf_forward.1
= control target key start
LH: loop header
LB: loop body
LE: loop exit
PB: predicated region body
PF: predicated region fallthrough
CT: control target
= control target key end

     0   :  { %s136_s15 = smov [#allocation3]   ;;  %s173_s0 = inlined_call_operand.vmem [shape: s32[16], index: 0, kind: input, shape index: {}]   ;;  %s174_s1 = inlined_call_operand.vmem [shape: f32[16,32], index: 1, kind: input, shape index: {}]   ;;  %s175_s2 = inlined_call_operand.hbm [shape: f32[11,32], index: 2, kind: input, shape index: {}]   ;;  %s176_s3 = inlined_call_operand.vmem [shape: f32[8,64], index: 3, kind: output, shape index: {}]  }
   0x1   :  { %s9_s14 = sshll.u32 %s173_s0, 4  ;;  %s10_s14 = int_to_ptr.vmem [resolvable:$true] %s9_s14 }
   0x2   :  { %12 = dma.vmem_to_smem %s10_s14, 16, %s136_s15, [#allocation2] }
   0x3   :  { %128 = dma.done.wait [#allocation2], 16 }
   0x4   :  { %129 = vsyncadd [#allocation2], 4294967280 }
   0x5   :  { %15 = sfence }
   0x6   :  { %16 = vsyncpa [#allocation5], 0  ;;  %s23_s18 = sshll.u32 %s175_s2, 4  ;;  %s137_s19 = smov [#allocation4]   ;;  %s24_s18 = int_to_ptr.hbm [resolvable:$true] %s23_s18 }
   0x7   :  { %s25_s20 = sshll.u32 %s137_s19, 4  ;;  %s138_s21 = smov 128   ;;  %s26_s20 = int_to_ptr.vmem [resolvable:$true] %s25_s20 }
   0x8   :  { %s139_s22 = smov 8  }
   0x9   :  { %31 = dma.hbm_to_vmem [thread:$0]  %s24_s18, 256, %s26_s20, [#allocation5], %s138_s21, %s138_s21, %s139_s22  }
   0xa   :  { %130 = dma.done.wait [#allocation5], 256  }
   0xb   :  { %131 = vsyncadd [#allocation5], 4294967040  ;;  %s132_s0 = smov 0  }
   0xc LB: > { %s74_s23 = sshll.u32 %s134_s0, 1  ;;  %s50_s2 = scalar_lea.vmem %s176_s3, %s134_s0  ;;  %vm51_vm0 = vcmask 253952   ;;  %vm59_vm1 = vcmask 516352   ;;  %s134_s0 = sphi %s132_s0, %s42_s0  }
   0xd   : > { %s45_s24 = sld [smem:[#allocation3 + %s74_s23]]  ;;  %s46_s25 = sadd.s32 1, %s74_s23 }
   0xe   : > { %s47_s26 = sld [smem:[#allocation3 + %s46_s25]]  ;;  %s140_s6 = smov 32  }
   0xf   : > { %s42_s0 = sadd.s32 1, %s134_s0  }
  0x10   : > { %p39_p0 = scmp.ge.s32.totalorder %s42_s0, 8  }
  0x13   : > { %s48_s4 = scalar_lea.vmem %s174_s1, %s45_s24 }
  0x14   : > { %v49_v0 = vld [vmem:[%s48_s4] sm:$0x1]  ;;  %s53_s5 = scalar_lea.vmem [#allocation4], %s47_s26 }
  0x15   : > { %v54_v1 = vld [vmem:[%s53_s5] sm:$0x1]  ;;  %52 = vst.msk [vmem:[%s50_s2] sm:$0x1] %vm51_vm0, %v49_v0 }
  0x16   : > { %56 = vrot.lane.b32.xlu0 %v54_v1, %s140_s6 }
  0x85   :  { %41 = sbr.rel (!%p39_p0) target bundleno = 12 (0xc), region = 42 }
  0x88   : > { %v57_v2 = vpop.permute.xlu0 %56 }
  0x89   : > { %60 = vst.msk [vmem:[%s50_s2] sm:$0x1] %vm59_vm1, %v57_v2 }
  0x8a   :  { %65 = vsyncpa [#allocation5], 1 }

</bundles_post_ra>
